<compile_context>
chip_gen: v7x
topology: tpu7x:2x2x1
jax: 0.10.0
libtpu: 0.0.40
codegen_flags: <defaults>
</compile_context>

<pallas_src>
import math
import jax
import jax.numpy as jnp
from jax.experimental import pallas as pl
from jax.experimental.pallas import tpu as pltpu


def _round_up(x, m):
    return ((x + m - 1) // m) * m


# ----------------------------- Pallas kernel --------------------------------

def node_feature_kernel(x_ref, in_idx_ref, out_idx_ref,
                        w1_ref, b1_ref, w2_ref, b2_ref,
                        in_tab_ref, out_tab_ref, o_ref):
    # float_encoder[0]: Linear(45 -> 1152pad) (+Dropout=id), then ReLU (f32).
    h = jnp.dot(x_ref[...], w1_ref[...], preferred_element_type=jnp.float32)
    h = jnp.maximum(h + b1_ref[...], 0.0)
    # float_encoder[1]: Linear(1152pad -> Hpad) (+Dropout=id), then ReLU (f32).
    h = jnp.dot(h.astype(jnp.bfloat16), w2_ref[...],
                preferred_element_type=jnp.float32)
    h = jnp.maximum(h + b2_ref[...], 0.0)

    # Fused degree-embedding gather: one-hot @ table on the MXU.  Exact
    # (0/1 weights, f32 tables).  Tables are tiny and VMEM-resident.
    tm = x_ref.shape[0]

    def emb_lookup(idx_ref, tab_ref):
        n = tab_ref.shape[0]
        iota = jax.lax.broadcasted_iota(jnp.int32, (tm, n), 1)
        onehot = (idx_ref[...] == iota).astype(jnp.float32)
        return jnp.dot(onehot, tab_ref[...], preferred_element_type=jnp.float32)

    deg = emb_lookup(in_idx_ref, in_tab_ref) + emb_lookup(out_idx_ref, out_tab_ref)
    o_ref[...] = (h + deg).astype(o_ref.dtype)


def node_feature_mlp(x_flat, in_idx, out_idx, w1, b1, w2, b2, in_tab, out_tab,
                     *, tm=256):
    """x_flat: (M, 45) bf16, in/out_idx: (M, 1) int32 -> (M_pad, H_pad) f32."""
    M, f_in = x_flat.shape
    f_mid = w1.shape[1]
    h_pad = w2.shape[1]
    n_in, n_out = in_tab.shape[0], out_tab.shape[0]

    tm = min(tm, _round_up(M, 16))          # don't over-pad tiny inputs
    m_pad = _round_up(M, tm)
    if m_pad != M:
        pad = m_pad - M
        x_flat = jnp.pad(x_flat, ((0, pad), (0, 0)))
        in_idx = jnp.pad(in_idx, ((0, pad), (0, 0)))    # padded rows use index 0
        out_idx = jnp.pad(out_idx, ((0, pad), (0, 0)))

    flops = 2 * m_pad * (f_in * f_mid + f_mid * h_pad + (n_in + n_out) * h_pad)
    bytes_accessed = (x_flat.size * 2 + (in_idx.size + out_idx.size) * 4
                      + (w1.size + w2.size) * 2
                      + (b1.size + b2.size + in_tab.size + out_tab.size) * 4
                      + m_pad * h_pad * 4)

    out = pl.pallas_call(
        node_feature_kernel,
        out_shape=jax.ShapeDtypeStruct((m_pad, h_pad), jnp.float32),
        grid_spec=pltpu.PrefetchScalarGridSpec(
            num_scalar_prefetch=0,
            grid=(m_pad // tm,),
            in_specs=[
                pl.BlockSpec((tm, f_in), lambda i: (i, 0)),       # x rows (bf16)
                pl.BlockSpec((tm, 1), lambda i: (i, 0)),          # in-degree ids
                pl.BlockSpec((tm, 1), lambda i: (i, 0)),          # out-degree ids
                pl.BlockSpec((f_in, f_mid), lambda i: (0, 0)),    # W1 (bf16, resident)
                pl.BlockSpec((1, f_mid), lambda i: (0, 0)),       # b1 (f32)
                pl.BlockSpec((f_mid, h_pad), lambda i: (0, 0)),   # W2 (bf16, resident)
                pl.BlockSpec((1, h_pad), lambda i: (0, 0)),       # b2 (f32)
                pl.BlockSpec((n_in, h_pad), lambda i: (0, 0)),    # in-degree table
                pl.BlockSpec((n_out, h_pad), lambda i: (0, 0)),   # out-degree table
            ],
            out_specs=pl.BlockSpec((tm, h_pad), lambda i: (i, 0)),
        ),
        compiler_params=pltpu.CompilerParams(
            dimension_semantics=("parallel",)),
        cost_estimate=pl.CostEstimate(flops=flops, transcendentals=0,
                                      bytes_accessed=bytes_accessed),
    )(x_flat, in_idx, out_idx, w1, b1, w2, b2, in_tab, out_tab)
    return out[:M]


# ----------------------------- Module wrapper --------------------------------

class GraphNodeFeaturePallas:
    F_IN = 45
    F_MID = 1050

    def __init__(self, key, num_heads, num_atoms, num_in_degree,
                 num_out_degree, hidden_dim, n_layers):
        self.num_heads = num_heads
        self.hidden_dim = hidden_dim
        self.f_mid_pad = _round_up(self.F_MID, 128)       # 1050 -> 1152
        self.h_pad = _round_up(hidden_dim, 128)           # H    -> 128

        keys = jax.random.split(key, 8)
        lin_std = 0.02 / math.sqrt(n_layers)
        emb_std = 0.02

        # float_encoder: two Linear layers, stored (in, out), zero-padded to
        # lane multiples (padded columns/rows are zero -> math unchanged).
        w1 = jax.random.normal(keys[0], (self.F_IN, self.F_MID), jnp.float32) * lin_std
        w2 = jax.random.normal(keys[1], (self.F_MID, hidden_dim), jnp.float32) * lin_std
        self.w1 = jnp.pad(w1, ((0, 0), (0, self.f_mid_pad - self.F_MID)))
        self.w2 = jnp.pad(w2, ((0, self.f_mid_pad - self.F_MID),
                               (0, self.h_pad - hidden_dim)))
        self.b1 = jnp.zeros((1, self.f_mid_pad), jnp.float32)
        self.b2 = jnp.zeros((1, self.h_pad), jnp.float32)
        # bf16 copies fed to the MXU; f32 kept for the reference path.
        self.w1_bf16 = self.w1.astype(jnp.bfloat16)
        self.w2_bf16 = self.w2.astype(jnp.bfloat16)

        # Embedding tables (init_params re-randomizes all rows incl. padding_idx,
        # matching PyTorch where .apply() runs after padding_idx zeroing).
        self.atom_emb = (jax.random.normal(keys[2], (num_atoms + 1, hidden_dim),
                                           jnp.float32) * emb_std)  # unused in fwd
        in_emb = jax.random.normal(keys[3], (num_in_degree, hidden_dim),
                                   jnp.float32) * emb_std
        out_emb = jax.random.normal(keys[4], (num_out_degree, hidden_dim),
                                    jnp.float32) * emb_std
        self.in_deg_emb = jnp.pad(in_emb, ((0, 0), (0, self.h_pad - hidden_dim)))
        self.out_deg_emb = jnp.pad(out_emb, ((0, 0), (0, self.h_pad - hidden_dim)))
        self.graph_token = (jax.random.normal(keys[5], (1, hidden_dim),
                                              jnp.float32) * emb_std)

    def __call__(self, batched_data):
        x = batched_data["x"]                      # (G, N, 45) float32
        in_degree = batched_data["in_degree"]      # (G, N) int32
        out_degree = batched_data["out_degree"]    # (G, N) int32
        n_graph, n_node, f_in = x.shape
        H = self.hidden_dim
        M = n_graph * n_node

        x_flat = x.reshape(M, f_in).astype(jnp.bfloat16)
        in_idx = in_degree.reshape(M, 1).astype(jnp.int32)
        out_idx = out_degree.reshape(M, 1).astype(jnp.int32)

        node_feat = node_feature_mlp(
            x_flat, in_idx, out_idx,
            self.w1_bf16, self.b1, self.w2_bf16, self.b2,
            self.in_deg_emb, self.out_deg_emb, tm=256)
        node_feat = node_feat[:, :H].reshape(n_graph, n_node, H)

        graph_tok = jnp.broadcast_to(self.graph_token[None, :, :],
                                     (n_graph, 1, H))
        # TODO(synk): write node rows from the kernel directly at row offset 1
        # of a (G, N+1, H) buffer to avoid this extra concat copy.
        return jnp.concatenate([graph_tok, node_feat], axis=1)


# ----------------------------- Reference (JAX, f32) ---------------------------

def reference_forward(mod, batched_data):
    x = batched_data["x"]
    H = mod.hidden_dim
    h = jnp.maximum(x @ mod.w1 + mod.b1[0], 0.0)
    h = jnp.maximum(h @ mod.w2 + mod.b2[0], 0.0)[..., :H]
    node = (h
            + jnp.take(mod.in_deg_emb[:, :H], batched_data["in_degree"], axis=0)
            + jnp.take(mod.out_deg_emb[:, :H], batched_data["out_degree"], axis=0))
    g = x.shape[0]
    tok = jnp.broadcast_to(mod.graph_token[None], (g, 1, H))
    return jnp.concatenate([tok, node], axis=1)


# --------------------------------- main ---------------------------------------

if __name__ == "__main__":
    key = jax.random.PRNGKey(0)
    k_param, k_x, k_in, k_out = jax.random.split(key, 4)

    num_heads = 4
    num_atoms = 16
    num_in_degree = 8
    num_out_degree = 8
    hidden_dim = 32
    n_layers = 2

    n_graph, n_node = 2, 8

    module = GraphNodeFeaturePallas(k_param, num_heads, num_atoms,
                                    num_in_degree, num_out_degree,
                                    hidden_dim, n_layers)

    batched_data = {
        "x": jax.random.normal(k_x, (n_graph, n_node, 45), jnp.float32),
        "in_degree": jax.random.randint(k_in, (n_graph, n_node), 0,
                                        num_in_degree, jnp.int32),
        "out_degree": jax.random.randint(k_out, (n_graph, n_node), 0,
                                         num_out_degree, jnp.int32),
    }

    out = module(batched_data)
    out = jax.block_until_ready(out)
    assert out.shape == (n_graph, n_node + 1, hidden_dim), out.shape

    ref = jax.block_until_ready(reference_forward(module, batched_data))
    # bf16 MXU inputs vs. f32 reference -> relaxed tolerance.
    assert jnp.allclose(out, ref, atol=5e-3, rtol=5e-2), "mismatch vs reference"

    print("KERNEL_OK")
</pallas_src>

<mosaic_0001>
module attributes {stable_mosaic.version = 11 : i64} {
  func.func @node_feature_kernel(%arg0: i32, %arg1: memref<16x45xbf16, #tpu.memory_space<vmem>>, %arg2: memref<16x1xi32, #tpu.memory_space<vmem>>, %arg3: memref<16x1xi32, #tpu.memory_space<vmem>>, %arg4: memref<45x1152xbf16, #tpu.memory_space<vmem>>, %arg5: memref<1x1152xf32, #tpu.memory_space<vmem>>, %arg6: memref<1152x128xbf16, #tpu.memory_space<vmem>>, %arg7: memref<1x128xf32, #tpu.memory_space<vmem>>, %arg8: memref<8x128xf32, #tpu.memory_space<vmem>>, %arg9: memref<8x128xf32, #tpu.memory_space<vmem>>, %arg10: memref<16x128xf32, #tpu.memory_space<vmem>>) attributes {dimension_semantics = [#tpu.dimension_semantics<parallel>], iteration_bounds = array<i64: 1>, scalar_prefetch = 0 : i64, scratch_operands = 0 : i64, tpu.core_type = #tpu.core_type<tc>, window_params = [{transform_indices = @transform_0, window_bounds = array<i64: 16, 45>}, {transform_indices = @transform_1, window_bounds = array<i64: 16, 1>}, {transform_indices = @transform_2, window_bounds = array<i64: 16, 1>}, {pipeline_mode = #tpu.pipeline_mode<synchronous>, transform_indices = @transform_3, window_bounds = array<i64: 45, 1152>}, {pipeline_mode = #tpu.pipeline_mode<synchronous>, transform_indices = @transform_4, window_bounds = array<i64: 1, 1152>}, {pipeline_mode = #tpu.pipeline_mode<synchronous>, transform_indices = @transform_5, window_bounds = array<i64: 1152, 128>}, {pipeline_mode = #tpu.pipeline_mode<synchronous>, transform_indices = @transform_6, window_bounds = array<i64: 1, 128>}, {pipeline_mode = #tpu.pipeline_mode<synchronous>, transform_indices = @transform_7, window_bounds = array<i64: 8, 128>}, {pipeline_mode = #tpu.pipeline_mode<synchronous>, transform_indices = @transform_8, window_bounds = array<i64: 8, 128>}, {transform_indices = @transform_9, window_bounds = array<i64: 16, 128>}]} {
    %c0 = arith.constant 0 : index
    %c0_0 = arith.constant 0 : index
    %0 = vector.load %arg1[%c0, %c0_0] : memref<16x45xbf16, #tpu.memory_space<vmem>>, vector<16x45xbf16>
    %c0_1 = arith.constant 0 : index
    %c0_2 = arith.constant 0 : index
    %1 = vector.load %arg4[%c0_1, %c0_2] : memref<45x1152xbf16, #tpu.memory_space<vmem>>, vector<45x1152xbf16>
    %cst = arith.constant dense<0.000000e+00> : vector<16x1152xf32>
    %2 = tpu.matmul %0, %1, %cst {dimension_numbers = #tpu.dot_dimension_numbers<[1], [0], [0], [1], [0, 0, 1, 1], [], []>} : vector<16x45xbf16>, vector<45x1152xbf16>, vector<16x1152xf32> -> vector<16x1152xf32>
    %c0_3 = arith.constant 0 : index
    %c0_4 = arith.constant 0 : index
    %3 = vector.load %arg5[%c0_3, %c0_4] : memref<1x1152xf32, #tpu.memory_space<vmem>>, vector<1x1152xf32>
    %4 = vector.broadcast %3 : vector<1x1152xf32> to vector<16x1152xf32>
    %5 = arith.addf %2, %4 : vector<16x1152xf32>
    %cst_5 = arith.constant 0.000000e+00 : f32
    %6 = vector.broadcast %cst_5 : f32 to vector<16x1152xf32>
    %7 = arith.maximumf %5, %6 : vector<16x1152xf32>
    %8 = arith.truncf %7 : vector<16x1152xf32> to vector<16x1152xbf16>
    %c0_6 = arith.constant 0 : index
    %c0_7 = arith.constant 0 : index
    %9 = vector.load %arg6[%c0_6, %c0_7] : memref<1152x128xbf16, #tpu.memory_space<vmem>>, vector<1152x128xbf16>
    %cst_8 = arith.constant dense<0.000000e+00> : vector<16x128xf32>
    %10 = tpu.matmul %8, %9, %cst_8 {dimension_numbers = #tpu.dot_dimension_numbers<[1], [0], [0], [1], [0, 0, 1, 1], [], []>} : vector<16x1152xbf16>, vector<1152x128xbf16>, vector<16x128xf32> -> vector<16x128xf32>
    %c0_9 = arith.constant 0 : index
    %c0_10 = arith.constant 0 : index
    %11 = vector.load %arg7[%c0_9, %c0_10] : memref<1x128xf32, #tpu.memory_space<vmem>>, vector<1x128xf32>
    %12 = vector.broadcast %11 : vector<1x128xf32> to vector<16x128xf32>
    %13 = arith.addf %10, %12 : vector<16x128xf32>
    %cst_11 = arith.constant 0.000000e+00 : f32
    %14 = vector.broadcast %cst_11 : f32 to vector<16x128xf32>
    %15 = arith.maximumf %13, %14 : vector<16x128xf32>
    %16 = tpu.iota {dimensions = array<i32: 1>} : vector<16x8xi32>
    %c0_12 = arith.constant 0 : index
    %c0_13 = arith.constant 0 : index
    %17 = vector.load %arg2[%c0_12, %c0_13] : memref<16x1xi32, #tpu.memory_space<vmem>>, vector<16x1xi32>
    %18 = vector.broadcast %17 : vector<16x1xi32> to vector<16x8xi32>
    %19 = arith.cmpi eq, %18, %16 : vector<16x8xi32>
    %20 = arith.extui %19 : vector<16x8xi1> to vector<16x8xi32>
    %21 = arith.sitofp %20 : vector<16x8xi32> to vector<16x8xf32>
    %c0_14 = arith.constant 0 : index
    %c0_15 = arith.constant 0 : index
    %22 = vector.load %arg8[%c0_14, %c0_15] : memref<8x128xf32, #tpu.memory_space<vmem>>, vector<8x128xf32>
    %cst_16 = arith.constant dense<0.000000e+00> : vector<16x128xf32>
    %23 = tpu.matmul %21, %22, %cst_16 {dimension_numbers = #tpu.dot_dimension_numbers<[1], [0], [0], [1], [0, 0, 1, 1], [], []>} : vector<16x8xf32>, vector<8x128xf32>, vector<16x128xf32> -> vector<16x128xf32>
    %24 = tpu.iota {dimensions = array<i32: 1>} : vector<16x8xi32>
    %c0_17 = arith.constant 0 : index
    %c0_18 = arith.constant 0 : index
    %25 = vector.load %arg3[%c0_17, %c0_18] : memref<16x1xi32, #tpu.memory_space<vmem>>, vector<16x1xi32>
    %26 = vector.broadcast %25 : vector<16x1xi32> to vector<16x8xi32>
    %27 = arith.cmpi eq, %26, %24 : vector<16x8xi32>
    %28 = arith.extui %27 : vector<16x8xi1> to vector<16x8xi32>
    %29 = arith.sitofp %28 : vector<16x8xi32> to vector<16x8xf32>
    %c0_19 = arith.constant 0 : index
    %c0_20 = arith.constant 0 : index
    %30 = vector.load %arg9[%c0_19, %c0_20] : memref<8x128xf32, #tpu.memory_space<vmem>>, vector<8x128xf32>
    %cst_21 = arith.constant dense<0.000000e+00> : vector<16x128xf32>
    %31 = tpu.matmul %29, %30, %cst_21 {dimension_numbers = #tpu.dot_dimension_numbers<[1], [0], [0], [1], [0, 0, 1, 1], [], []>} : vector<16x8xf32>, vector<8x128xf32>, vector<16x128xf32> -> vector<16x128xf32>
    %32 = arith.addf %23, %31 : vector<16x128xf32>
    %33 = arith.addf %15, %32 : vector<16x128xf32>
    %c0_22 = arith.constant 0 : index
    %c0_23 = arith.constant 0 : index
    %34 = vector.load %arg10[%c0_22, %c0_23] : memref<16x128xf32, #tpu.memory_space<vmem>>, vector<16x128xf32>
    tpu.vector_store %arg10[%c0_22, %c0_23], %33 {strides = array<i32>} : memref<16x128xf32, #tpu.memory_space<vmem>>, vector<16x128xf32>,
    return
  }
  func.func @transform_0(%arg0: i32) -> (i32, i32) {
    %c0_i32 = arith.constant 0 : i32
    %c0_i32_0 = arith.constant 0 : i32
    return %arg0, %c0_i32 : i32, i32
  }
  func.func @transform_1(%arg0: i32) -> (i32, i32) {
    %c0_i32 = arith.constant 0 : i32
    %c0_i32_0 = arith.constant 0 : i32
    return %arg0, %c0_i32 : i32, i32
  }
  func.func @transform_2(%arg0: i32) -> (i32, i32) {
    %c0_i32 = arith.constant 0 : i32
    %c0_i32_0 = arith.constant 0 : i32
    return %arg0, %c0_i32 : i32, i32
  }
  func.func @transform_3(%arg0: i32) -> (i32, i32) {
    %c0_i32 = arith.constant 0 : i32
    %c0_i32_0 = arith.constant 0 : i32
    %c0_i32_1 = arith.constant 0 : i32
    return %c0_i32, %c0_i32_0 : i32, i32
  }
  func.func @transform_4(%arg0: i32) -> (i32, i32) {
    %c0_i32 = arith.constant 0 : i32
    %c0_i32_0 = arith.constant 0 : i32
    %c0_i32_1 = arith.constant 0 : i32
    return %c0_i32, %c0_i32_0 : i32, i32
  }
  func.func @transform_5(%arg0: i32) -> (i32, i32) {
    %c0_i32 = arith.constant 0 : i32
    %c0_i32_0 = arith.constant 0 : i32
    %c0_i32_1 = arith.constant 0 : i32
    return %c0_i32, %c0_i32_0 : i32, i32
  }
  func.func @transform_6(%arg0: i32) -> (i32, i32) {
    %c0_i32 = arith.constant 0 : i32
    %c0_i32_0 = arith.constant 0 : i32
    %c0_i32_1 = arith.constant 0 : i32
    return %c0_i32, %c0_i32_0 : i32, i32
  }
  func.func @transform_7(%arg0: i32) -> (i32, i32) {
    %c0_i32 = arith.constant 0 : i32
    %c0_i32_0 = arith.constant 0 : i32
    %c0_i32_1 = arith.constant 0 : i32
    return %c0_i32, %c0_i32_0 : i32, i32
  }
  func.func @transform_8(%arg0: i32) -> (i32, i32) {
    %c0_i32 = arith.constant 0 : i32
    %c0_i32_0 = arith.constant 0 : i32
    %c0_i32_1 = arith.constant 0 : i32
    return %c0_i32, %c0_i32_0 : i32, i32
  }
  func.func @transform_9(%arg0: i32) -> (i32, i32) {
    %c0_i32 = arith.constant 0 : i32
    %c0_i32_0 = arith.constant 0 : i32
    return %arg0, %c0_i32 : i32, i32
  }
}

</mosaic_0001>

<bundles_post_ra>
// kernel: tpu_custom_call.1
= control target key start
LH: loop header
LB: loop body
LE: loop exit
PB: predicated region body
PF: predicated region fallthrough
CT: control target
= control target key end

     0   :  { %14 = vsyncpa [#allocation3], 0  ;;  %s2208_s0 = inlined_call_operand.vmem [shape: bf16[16,45], index: 0, kind: input, shape index: {}]   ;;  %s2209_s1 = inlined_call_operand.vmem [shape: s32[16,1], index: 1, kind: input, shape index: {}]   ;;  %s2210_s2 = inlined_call_operand.vmem [shape: s32[16,1], index: 2, kind: input, shape index: {}]   ;;  %s2211_s3 = inlined_call_operand.hbm [shape: bf16[45,1152], index: 3, kind: input, shape index: {}]   ;;  %s2212_s4 = inlined_call_operand.vmem [shape: f32[1,1152], index: 4, kind: input, shape index: {}]   ;;  %s2213_s5 = inlined_call_operand.hbm [shape: bf16[1152,128], index: 5, kind: input, shape index: {}]   ;;  %s2214_s6 = inlined_call_operand.vmem [shape: f32[1,128], index: 6, kind: input, shape index: {}]   ;;  %s2215_s7 = inlined_call_operand.vmem [shape: f32[8,128], index: 7, kind: input, shape index: {}]   ;;  %s2216_s8 = inlined_call_operand.vmem [shape: f32[8,128], index: 8, kind: input, shape index: {}]   ;;  %s2217_s9 = inlined_call_operand.hbm [shape: f32[16,128], index: 9, kind: output, shape index: {}]  }
   0x1   :  { %15 = vsyncpa [#allocation6], 0 }
   0x2   :  { %16 = vsyncpa [#allocation4], 0  ;;  %s2022_s30 = smov [#allocation2]   ;;  %s1950_s13 = scalar_lea.hbm %s2211_s3, 3456 }
   0x3   :  { %s28_s10 = sshll.u32 %s2022_s30, 4  ;;  %p1951_p0 = scmp.ne.s32.totalorder %s2211_s3, %s1950_s13  ;;  %s29_s10 = int_to_ptr.vmem [resolvable:$true] %s28_s10 }
   0x4   :  { %p1954_p1 = scmp.lt.u32.totalorder %s1950_s13, %s2211_s3 }
   0x6   :  { %p1956_p2 = pnand %p1954_p1, %p1951_p0 }
   0x8   :  { %1959 = shalt.err (!%p1956_p2)
}
   0x9   :  { %s1960_s18 = scalar_lea.vmem %s29_s10, 3456  ;;  %p1965_p4 = scmp.lt.s32.totalorder %s29_s10, %s29_s10 }
   0xa   :  { %p1961_p3 = scmp.ne.s32.totalorder %s29_s10, %s1960_s18  ;;  %p1966_p5 = scmp.lt.s32.totalorder %s1960_s18, %s1960_s18 }
   0xc   :  { %p1967_p6 = por %p1966_p5, %p1965_p4 }
   0xe   :  { %p1968_p7 = pnand %p1967_p6, %p1961_p3 }
  0x10   :  { %1971 = shalt.err (!%p1968_p7)
}
  0x11   :  { %s2023_s19 = smov 576   ;;  %s2024_s20 = smov 36  }
  0x12   :  { %34 = dma.hbm_to_vmem [thread:$0]  %s2211_s3, 3456, %s29_s10, [#allocation3], %s2023_s19, %s2023_s19, %s2024_s20  }
  0x13   :  { %s2025_s23 = smov [#allocation5]   ;;  %s1972_s27 = scalar_lea.hbm %s2213_s5, 9216 }
  0x14   :  { %s42_s24 = sshll.u32 %s2025_s23, 4  ;;  %p1973_p8 = scmp.ne.s32.totalorder %s2213_s5, %s1972_s27  ;;  %s43_s24 = int_to_ptr.vmem [resolvable:$true] %s42_s24 }
  0x15   :  { %p1976_p9 = scmp.lt.u32.totalorder %s1972_s27, %s2213_s5 }
  0x17   :  { %p1978_p10 = pnand %p1976_p9, %p1973_p8 }
  0x19   :  { %1981 = shalt.err (!%p1978_p10)
}
  0x1a   :  { %s1982_s12 = scalar_lea.vmem %s43_s24, 9216  ;;  %p1987_p12 = scmp.lt.s32.totalorder %s43_s24, %s43_s24 }
  0x1b   :  { %p1983_p11 = scmp.ne.s32.totalorder %s43_s24, %s1982_s12  ;;  %p1988_p13 = scmp.lt.s32.totalorder %s1982_s12, %s1982_s12 }
  0x1d   :  { %p1989_p0 = por %p1988_p13, %p1987_p12 }
  0x1f   :  { %p1990_p1 = pnand %p1989_p0, %p1983_p11 }
  0x21   :  { %1993 = shalt.err (!%p1990_p1)
}
  0x22   :  { %s2026_s3 = smov 64   ;;  %s2027_s10 = smov 4  }
  0x23   :  { %48 = dma.hbm_to_vmem [thread:$0]  %s2213_s5, 9216, %s43_s24, [#allocation6], %s2026_s3, %s2026_s3, %s2027_s10  }
  0x24   :  { %2016 = dma.done.wait [#allocation3], 3456  }
  0x25   :  { %2017 = vsyncadd [#allocation3], 4294963840 }
  0x26   :  { %2018 = dma.done.wait [#allocation6], 9216  }
  0x27   :  { %2019 = vsyncadd [#allocation6], 4294958080  ;;  %v2028_v0 = vmov 0   ;;  %vm281_vm0 = vcmask 1045504   ;;  %v1838_v1 = vld [vmem:[#allocation2 + $0x4] ss:$36 sps:$4 sm:$0xff]  }
  0x28   :  { %344 = vmatprep.mubr.bf16.mxu0 %v2028_v0  ;;  %387 = vmatprep.mubr.bf16.mxu1 %v2028_v0  ;;  %v1840_v2 = vld [vmem:[#allocation2] ss:$36 sps:$4 sm:$0xff]   ;;  %vm282_vm1 = vcmask 1046528   ;;  %v1841_v3 = vld [vmem:[#allocation2 + $0xc] ss:$36 sps:$4 sm:$0xff]   ;;  %v2029_v5 = vmov 65535  }
  0x29   :  { %1836 = vset.pattern.permute.xlu0 %v2028_v0  ;;  %1837 = vset.pattern.permute.xlu1 %v2028_v0  ;;  %v1843_v4 = vld [vmem:[#allocation2 + $0x8] ss:$36 sps:$4 sm:$0xff]   ;;  %v283_v6 = vsel %vm281_vm0, 4294967295, %v2029_v5  ;;  %v1847_v9 = vld [vmem:[#allocation2 + $0x54] ss:$36 sps:$4 sm:$0xff]   ;;  %v2118_v20 = vld [vmem:[%s2208_s0] sm:$0xff]  }
  0x2a   :  { %312 = vmatprep.subr.bf16.mxu0 %v1838_v1  ;;  %v1844_v7 = vld [vmem:[#allocation2 + $0x4c] ss:$36 sps:$4 sm:$0xff]   ;;  %355 = vmatprep.subr.bf16.mxu1 %v1841_v3  ;;  %v2109_v11 = vsel %vm282_vm1, %v283_v6, 0  ;;  %v1850_v12 = vld [vmem:[#allocation2 + $0x94] ss:$36 sps:$4 sm:$0x7f]  }
  0x2b   :  { %313 = vmatpush1.bf16.msra.mxu0 %v1840_v2  ;;  %v1846_v8 = vld [vmem:[#allocation2 + $0x48] ss:$36 sps:$4 sm:$0xff]   ;;  %356 = vmatpush1.bf16.msra.mxu1 %v1843_v4  ;;  %v1849_v10 = vld [vmem:[#allocation2 + $0x50] ss:$36 sps:$4 sm:$0xff]   ;;  %v289_v15 = vand.u32 %v1850_v12, %v2109_v11  ;;  %vm277_vm2 = vcmask 367616   ;;  %v1359_v36 = vld [vmem:[%s2210_s2] sm:$0xff] }
  0x2c   :  { %314 = vmatprep.subr.bf16.mxu0 %v1844_v7  ;;  %357 = vmatprep.subr.bf16.mxu1 %v1847_v9  ;;  %v1852_v13 = vld [vmem:[#allocation2 + $0x90] ss:$36 sps:$4 sm:$0x7f]   ;;  %v1853_v14 = vld [vmem:[#allocation2 + $0x9c] ss:$36 sps:$4 sm:$0x7f]  }
  0x2d   :  { %v286_v16 = vand.u32 %v1852_v13, %v2109_v11  ;;  %v1855_v17 = vld [vmem:[#allocation2 + $0x98] ss:$36 sps:$4 sm:$0x7f]   ;;  %v295_v18 = vand.u32 %v1853_v14, %v2109_v11  ;;  %v1857_v22 = vld [vmem:[#allocation2 + $0x10] ss:$36 sps:$4 sm:$0xff]   ;;  %1362 = vperm.xlu0 %1836, %v1359_v36   ;;  %v1344_v39 = vld [vmem:[%s2209_s1] sm:$0xff] }
  0x2e   :  { %v292_v19 = vand.u32 %v1855_v17, %v2109_v11  ;;  %v1859_v21 = vld [vmem:[#allocation2 + $0x14] ss:$36 sps:$4 sm:$0xff]   ;;  %v1862_v23 = vld [vmem:[#allocation2 + $0x5c] ss:$36 sps:$4 sm:$0xff]   ;;  %v1871_v31 = vld [vmem:[#allocation2 + $0x64] ss:$36 sps:$4 sm:$0xff]   ;;  %1347 = vperm.xlu1 %1837, %v1344_v39  }
  0x2f   :  { %315 = vmatpush1.bf16.msra.mxu0 %v1846_v8  ;;  %358 = vmatpush1.bf16.msra.mxu1 %v1849_v10  ;;  %v1863_v24 = vld [vmem:[#allocation2 + $0x18] ss:$36 sps:$4 sm:$0xff]   ;;  %v1866_v27 = vld [vmem:[#allocation2 + $0xa0] ss:$36 sps:$4 sm:$0x7f]   ;;  %v1360_v40 = vld [vmem:[%s2210_s2 + $0x8] sm:$0xff] }
  0x30   :  { %316 = vmatprep.subr.bf16.mxu0 %v289_v15  ;;  %359 = vmatprep.subr.bf16.mxu1 %v295_v18  ;;  %v1860_v25 = vld [vmem:[#allocation2 + $0x58] ss:$36 sps:$4 sm:$0xff]   ;;  %v1868_v28 = vld [vmem:[#allocation2 + $0xa4] ss:$36 sps:$4 sm:$0x7f]   ;;  %v298_v34 = vand.u32 %v1866_v27, %v2109_v11  ;;  %v2030_v42 = vmov 0.0  }
  0x31   :  { %v1865_v26 = vld [vmem:[#allocation2 + $0x1c] ss:$36 sps:$4 sm:$0xff]   ;;  %v301_v30 = vand.u32 %v1868_v28, %v2109_v11  ;;  %v1872_v32 = vld [vmem:[#allocation2 + $0xa8] ss:$36 sps:$4 sm:$0x7f]   ;;  %1365 = vperm.xlu0 %1836, %v1360_v40   ;;  %vm2031_vm3 = vmmov 0  }
  0x32   :  { %v1869_v29 = vld [vmem:[#allocation2 + $0x60] ss:$36 sps:$4 sm:$0xff]   ;;  %v1874_v33 = vld [vmem:[#allocation2 + $0xac] ss:$36 sps:$4 sm:$0x7f]   ;;  %v304_v37 = vand.u32 %v1872_v32, %v2109_v11  ;;  %v1878_v45 = vld [vmem:[#allocation5 + $0x40] sm:$0xff]  }
  0x33   :  { %317 = vmatpush1.bf16.msra.mxu0 %v286_v16  ;;  %360 = vmatpush1.bf16.msra.mxu1 %v292_v19  ;;  %v307_v35 = vand.u32 %v1874_v33, %v2109_v11  ;;  %v1875_v38 = vld [vmem:[#allocation2 + $0x20] ss:$36 sps:$4 sm:$0xff]   ;;  %v1345_v41 = vld [vmem:[%s2209_s1 + $0x8] sm:$0xff]  ;;  %v1877_v44 = vld [vmem:[#allocation2 + $0xb0] ss:$36 sps:$4 sm:$0x7f]   ;;  %v98_v16 = vlaneseq }
  0x34   :  { %398 = vmatprep.subr.bf16.mxu0 %v1859_v21  ;;  %441 = vmatprep.subr.bf16.mxu1 %v1865_v26  ;;  %v1876_v43 = vld [vmem:[#allocation2 + $0x68] ss:$36 sps:$4 sm:$0xff]   ;;  %v1879_v46 = vld [vmem:[#allocation5] sm:$0xff]   ;;  %v1882_v47 = vld [vmem:[#allocation5 + $0x48] sm:$0xff]   ;;  %v310_v49 = vand.u32 %v1877_v44, %v2109_v11  ;;  %vm1374_vm5 = vcmask 64512  }
  0x35   :  { %1350 = vperm.xlu1 %1837, %v1345_v41   ;;  %v1883_v48 = vld [vmem:[#allocation5 + $0x8] sm:$0xff]   ;;  %v1886_v50 = vld [vmem:[#allocation5 + $0x50] sm:$0xff]   ;;  %v1880_v51 = vld [vmem:[#allocation5 + $0xc0] sm:$0xff]   ;;  %v99_v17 = vshrl.u32 %v98_v16, 7 }
  0x36   :  { %1588 = vmatmul.mubr.msk.bf16.vlgmr.msra.gmra.mrb[0].mxu0 %vm277_vm2, %v2118_v20  ;;  %1589 = vmatmul.mubr.msk.bf16.vlgmr.msra.gmra.mrb[0].mxu1 %vm277_vm2, %v2118_v20  ;;  %v1881_v52 = vld [vmem:[#allocation5 + $0x80] sm:$0xff]   ;;  %v1887_v53 = vld [vmem:[#allocation5 + $0x10] sm:$0xff]   ;;  %v1890_v54 = vld [vmem:[#allocation5 + $0x58] sm:$0xff]  }
  0x37   :  { %399 = vmatpush1.bf16.msra.mxu0 %v1857_v22  ;;  %442 = vmatpush1.bf16.msra.mxu1 %v1863_v24  ;;  %v1884_v55 = vld [vmem:[#allocation5 + $0xc8] sm:$0xff]   ;;  %v1891_v57 = vld [vmem:[#allocation5 + $0x18] sm:$0xff]   ;;  %v1894_v58 = vld [vmem:[#allocation5 + $0x60] sm:$0xff]   ;;  %v100_v18 = vsub.s32 0, %v99_v17  ;;  %v108_v21 = vsub.s32 2, %v99_v17  ;;  %v112_v22 = vsub.s32 3, %v99_v17 }
  0x38   :  { %400 = vmatprep.subr.bf16.mxu0 %v1862_v23  ;;  %430 = vmatprep.mubr.bf16.mxu0 %v2028_v0  ;;  %v1885_v56 = vld [vmem:[#allocation5 + $0x88] sm:$0xff]   ;;  %v1888_v59 = vld [vmem:[#allocation5 + $0xd0] sm:$0xff]   ;;  %v1895_v61 = vld [vmem:[#allocation5 + $0x20] sm:$0xff]   ;;  %v116_v40 = vsub.s32 4, %v99_v17  ;;  %v120_v41 = vsub.s32 5, %v99_v17 }
  0x39   :  { %443 = vmatprep.subr.bf16.mxu1 %v1871_v31  ;;  %473 = vmatprep.mubr.bf16.mxu1 %v2028_v0  ;;  %v1889_v60 = vld [vmem:[#allocation5 + $0x90] sm:$0xff]   ;;  %v1898_v62 = vld [vmem:[#allocation5 + $0x68] sm:$0xff]   ;;  %v1892_v63 = vld [vmem:[#allocation5 + $0xd8] sm:$0xff]  }
  0x3a   :  { %v1899_v0 = vld [vmem:[#allocation5 + $0x28] sm:$0xff]   ;;  %v1893_v1 = vld [vmem:[#allocation5 + $0x98] sm:$0xff]   ;;  %v1896_v2 = vld [vmem:[#allocation5 + $0xe0] sm:$0xff]  }
  0x3b   :  { %401 = vmatpush1.bf16.msra.mxu0 %v1860_v25  ;;  %444 = vmatpush1.bf16.msra.mxu1 %v1869_v29  ;;  %v1897_v3 = vld [vmem:[#allocation5 + $0xa0] sm:$0xff]   ;;  %v1900_v4 = vld [vmem:[#allocation5 + $0xe8] sm:$0xff]   ;;  %v1902_v6 = vld [vmem:[#allocation5 + $0x70] sm:$0xff]  }
  0x3c   :  { %402 = vmatprep.subr.bf16.mxu0 %v301_v30  ;;  %445 = vmatprep.subr.bf16.mxu1 %v307_v35  ;;  %v1901_v5 = vld [vmem:[#allocation5 + $0xa8] sm:$0xff]   ;;  %v1903_v7 = vld [vmem:[#allocation5 + $0x30] sm:$0xff]   ;;  %v1906_v10 = vld [vmem:[#allocation5 + $0x78] sm:$0xff]  }
  0x3d   :  { %v1904_v8 = vld [vmem:[#allocation5 + $0xf0] sm:$0xff]   ;;  %v1907_v11 = vld [vmem:[#allocation5 + $0x38] sm:$0xff]   ;;  %v1910_v14 = vld [vmem:[#allocation5 + $0x140] sm:$0xff]  }
  0x3e   :  { %v1905_v9 = vld [vmem:[#allocation5 + $0xb0] sm:$0xff]   ;;  %v1908_v12 = vld [vmem:[#allocation5 + $0xf8] sm:$0xff]   ;;  %v1912_v15 = vld [vmem:[#allocation5 + $0x1c0] sm:$0xff]  }
  0x3f   :  { %403 = vmatpush1.bf16.msra.mxu0 %v298_v34  ;;  %446 = vmatpush1.bf16.msra.mxu1 %v304_v37  ;;  %v1909_v13 = vld [vmem:[#allocation5 + $0xb8] sm:$0xff]   ;;  %v94_v19 = vld [vmem:[%s2212_s4] sm:$0xff] }
  0x40   :  { %1781 = vmatprep.subr.bf16.mxu0 %v2030_v42  ;;  %1678 = vmatprep.subr.bf16.mxu1 %v1878_v45  ;;  %v101_v23 = vrot.slane %v94_v19, %v100_v18  ;;  %v109_v25 = vrot.slane %v94_v19, %v108_v21  ;;  %v113_v27 = vrot.slane %v94_v19, %v112_v22  ;;  %v1919_v21 = vld [vmem:[#allocation5 + $0x110] sm:$0xff]  }
  0x42   :  { %1590 = vmatmul.mubr.msk.bf16.vlgmr.msra.gmra.mrb[4].mxu0 %vm277_vm2, %v2118_v20  ;;  %1591 = vmatmul.mubr.msk.bf16.vlgmr.msra.gmra.mrb[4].mxu1 %vm277_vm2, %v2118_v20 }
  0x43   :  { %1782 = vmatpush3.bf16.msra.mxu0 %v1875_v38  ;;  %1787 = vmatprep.mubr.msk.bf16.mxu0 %vm2031_vm3, %v2030_v42 }
  0x44   :  { %1783 = vmatprep.subr.bf16.mxu0 %v2030_v42  ;;  %1679 = vmatpush3.bf16.msra.mxu1 %v1879_v46 }
  0x45   :  { %1680 = vmatprep.subr.bf16.mxu1 %v1882_v47 }
  0x47   :  { %1784 = vmatpush3.bf16.msra.mxu0 %v1876_v43 }
  0x48   :  { %1785 = vmatprep.subr.bf16.mxu0 %v2030_v42  ;;  %1681 = vmatpush3.bf16.msra.mxu1 %v1883_v48 }
  0x49   :  { %1682 = vmatprep.subr.bf16.mxu1 %v1886_v50 }
  0x4b   :  { %1786 = vmatpush3.bf16.msra.mxu0 %v310_v49 }
  0x4c   :  { %1700 = vmatprep.subr.bf16.mxu0 %v1880_v51  ;;  %1683 = vmatpush3.bf16.msra.mxu1 %v1887_v53 }
  0x4d   :  { %1684 = vmatprep.subr.bf16.mxu1 %v1890_v54  ;;  %v124_v54 = vsub.s32 6, %v99_v17 }
  0x4e   :  { %1788 = vmatmul.mubr.msk.bf16.vlgmr.msra.gmra.mrb[8].mxu0 %vm277_vm2, %v2118_v20  ;;  %v104_v20 = vsub.s32 1, %v99_v17 }
  0x4f   :  { %1701 = vmatpush3.bf16.msra.mxu0 %v1881_v52 }
  0x50   :  { %1702 = vmatprep.subr.bf16.mxu0 %v1884_v55  ;;  %1685 = vmatpush3.bf16.msra.mxu1 %v1891_v57  ;;  %v105_v24 = vrot.slane %v94_v19, %v104_v20  ;;  %v1911_v57 = vld [vmem:[#allocation5 + $0x100] sm:$0xff]  }
  0x51   :  { %1686 = vmatprep.subr.bf16.mxu1 %v1894_v58  ;;  %v128_v58 = vsub.s32 7, %v99_v17 }
  0x53   :  { %1703 = vmatpush3.bf16.msra.mxu0 %v1885_v56 }
  0x54   :  { %1704 = vmatprep.subr.bf16.mxu0 %v1888_v59  ;;  %1687 = vmatpush3.bf16.msra.mxu1 %v1895_v61  ;;  %v117_v61 = vrot.slane %v94_v19, %v116_v40  ;;  %v1926_v40 = vld [vmem:[#allocation5 + $0x160] sm:$0xff]  }
  0x55   :  { %1688 = vmatprep.subr.bf16.mxu1 %v1898_v62 }
  0x57   :  { %1705 = vmatpush3.bf16.msra.mxu0 %v1889_v60  ;;  %v1914_v60 = vld [vmem:[#allocation5 + $0x148] sm:$0xff]  }
  0x58   :  { %1706 = vmatprep.subr.bf16.mxu0 %v1892_v63  ;;  %1689 = vmatpush3.bf16.msra.mxu1 %v1899_v0  ;;  %v1913_v63 = vld [vmem:[#allocation5 + $0x180] sm:$0xff]   ;;  %v121_v0 = vrot.slane %v94_v19, %v120_v41 }
  0x59   :  { %1690 = vmatprep.subr.bf16.mxu1 %v1902_v6  ;;  %v1918_v6 = vld [vmem:[#allocation5 + $0x150] sm:$0xff]  }
  0x5b   :  { %1707 = vmatpush3.bf16.msra.mxu0 %v1893_v1  ;;  %v1916_v1 = vld [vmem:[#allocation5 + $0x1c8] sm:$0xff]  }
  0x5c   :  { %1708 = vmatprep.subr.bf16.mxu0 %v1896_v2  ;;  %1691 = vmatpush3.bf16.msra.mxu1 %v1903_v7  ;;  %v125_v2 = vrot.slane %v94_v19, %v124_v54  ;;  %v1932_v54 = vld [vmem:[#allocation5 + $0x1e8] sm:$0xff]  }
  0x5d   :  { %1692 = vmatprep.subr.bf16.mxu1 %v1906_v10 }
  0x5f   :  { %1709 = vmatpush3.bf16.msra.mxu0 %v1897_v3  ;;  %v1915_v3 = vld [vmem:[#allocation5 + $0x108] sm:$0xff]  }
  0x60   :  { %1710 = vmatprep.subr.bf16.mxu0 %v1900_v4  ;;  %1693 = vmatpush3.bf16.msra.mxu1 %v1907_v11 }
  0x61   :  { %1722 = vmatprep.subr.bf16.mxu1 %v1910_v14 }
  0x63   :  { %1711 = vmatpush3.bf16.msra.mxu0 %v1901_v5  ;;  %v129_v5 = vrot.slane %v94_v19, %v128_v58  ;;  %v1931_v58 = vld [vmem:[#allocation5 + $0x128] sm:$0xff]  }
  0x64   :  { %1712 = vmatprep.subr.bf16.mxu0 %v1904_v8 }
  0x67   :  { %1713 = vmatpush3.bf16.msra.mxu0 %v1905_v9  ;;  %v1917_v9 = vld [vmem:[#allocation5 + $0x188] sm:$0xff]  }
  0x68   :  { %1714 = vmatprep.subr.bf16.mxu0 %v1908_v12 }
  0x6b   :  { %1715 = vmatpush3.bf16.msra.mxu0 %v1909_v13  ;;  %v1920_v13 = vld [vmem:[#allocation5 + $0x1d0] sm:$0xff]  }
  0x6c   :  { %1744 = vmatprep.subr.bf16.mxu0 %v1912_v15 }
 0x109   :  { %v346_v26 = vpop.f32.mrb[0].mxu0  ;;  %v389_v32 = vpop.f32.mrb[0].mxu1 }
 0x10a   :  { %v347_v28 = vadd.f32 %v346_v26, %v101_v23  ;;  %v348_v29 = vpop.f32.mrb[1].mxu0  ;;  %v390_v34 = vadd.f32 %v389_v32, %v109_v25  ;;  %v391_v36 = vpop.f32.mrb[1].mxu1 }
 0x10b   :  { %v349_v30 = vadd.f32 %v348_v29, %v105_v24  ;;  %v350_v31 = vpop.f32.mrb[2].mxu0  ;;  %v392_v38 = vadd.f32 %v391_v36, %v113_v27  ;;  %v393_v39 = vpop.f32.mrb[2].mxu1 }
 0x10c   :  { %v351_v33 = vadd.f32 %v350_v31, %v101_v23  ;;  %v352_v35 = vpop.f32.mrb[3].mxu0  ;;  %v525_v43 = vmax.f32 %v347_v28, 0.0  ;;  %v527_v45 = vmax.f32 %v390_v34, 0.0  ;;  %v394_v46 = vadd.f32 %v393_v39, %v109_v25  ;;  %v395_v47 = vpop.f32.mrb[3].mxu1  ;;  %v1922_v25 = vld [vmem:[#allocation5 + $0x158] sm:$0xff]  }
 0x10d   :  { %v353_v37 = vadd.f32 %v352_v35, %v105_v24  ;;  %v526_v48 = vmax.f32 %v349_v30, 0.0  ;;  %v528_v50 = vmax.f32 %v392_v38, 0.0  ;;  %v396_v51 = vadd.f32 %v395_v47, %v113_v27  ;;  %v1921_v30 = vld [vmem:[#allocation5 + $0x190] sm:$0xff]   ;;  %v1924_v34 = vld [vmem:[#allocation5 + $0x1d8] sm:$0xff]   ;;  %v1927_v47 = vld [vmem:[#allocation5 + $0x120] sm:$0xff]  }
 0x10e   :  { %v534_v44 = vmax.f32 %v351_v33, 0.0  ;;  %v536_v53 = vmax.f32 %v394_v46, 0.0  ;;  %v1928_v46 = vld [vmem:[#allocation5 + $0x1e0] sm:$0xff]  }
 0x10f   :  { %v535_v49 = vmax.f32 %v353_v37, 0.0  ;;  %v537_v56 = vmax.f32 %v396_v51, 0.0  ;;  %v1923_v37 = vld [vmem:[#allocation5 + $0x118] sm:$0xff]  }
 0x110   :  { %v543_v52 = vpack.c.bf16 %v534_v44, %v525_v43  ;;  %v545_v59 = vpack.c.bf16 %v536_v53, %v527_v45  ;;  %v1925_v43 = vld [vmem:[#allocation5 + $0x198] sm:$0xff]   ;;  %v1559_v45 = vld [vmem:[%s2212_s4 + $0x8] ss:$0 sm:$0xff] }
 0x111   :  { %v544_v55 = vpack.c.bf16 %v535_v49, %v526_v48  ;;  %v546_v62 = vpack.c.bf16 %v537_v56, %v528_v50  ;;  %v1930_v49 = vld [vmem:[#allocation5 + $0x168] sm:$0xff]  }
 0x113   :  { %1167 = vmatprep.mubr.bf16.mxu1 %v544_v55  ;;  %1208 = vmatprep.mubr.bf16.mxu0 %v546_v62  ;;  %v1936_v62 = vld [vmem:[#allocation5 + $0x1f0] sm:$0xff]  }
 0x114   :  { %1168 = vmatmul.mubr.bf16.vlgmr.msra.gmra.mrb[8].mxu1 %v543_v52  ;;  %1209 = vmatmul.mubr.bf16.vlgmr.msra.gmra.mrb[12].mxu0 %v545_v59  ;;  %v1929_v52 = vld [vmem:[#allocation5 + $0x1a0] sm:$0xff]   ;;  %v1934_v59 = vld [vmem:[#allocation5 + $0x170] sm:$0xff]  }
 0x115   :  { %1723 = vmatpush3.bf16.msra.mxu1 %v1911_v57  ;;  %v432_v4 = vpop.f32.mrb[4].mxu0  ;;  %1745 = vmatpush3.bf16.msra.mxu0 %v1913_v63  ;;  %v475_v12 = vpop.f32.mrb[4].mxu1 }
 0x116   :  { %1724 = vmatprep.subr.bf16.mxu1 %v1914_v60  ;;  %v433_v7 = vadd.f32 %v432_v4, %v117_v61  ;;  %v434_v8 = vpop.f32.mrb[5].mxu0  ;;  %1746 = vmatprep.subr.bf16.mxu0 %v1916_v1  ;;  %v476_v18 = vadd.f32 %v475_v12, %v125_v2  ;;  %v477_v20 = vpop.f32.mrb[5].mxu1  ;;  %v1938_v1 = vld [vmem:[#allocation5 + $0x178] sm:$0xff]   ;;  %v1358_v12 = vld [vmem:[%s2215_s7] sm:$0xff] }
 0x117   :  { %v435_v10 = vadd.f32 %v434_v8, %v121_v0  ;;  %v436_v11 = vpop.f32.mrb[6].mxu0  ;;  %v478_v23 = vadd.f32 %v477_v20, %v129_v5  ;;  %v479_v24 = vpop.f32.mrb[6].mxu1  ;;  %v1939_v4 = vld [vmem:[#allocation5 + $0x138] sm:$0xff]   ;;  %v1942_v8 = vld [vmem:[#allocation5 + $0x200] sm:$0xff]  }
 0x118   :  { %v529_v14 = vmax.f32 %v433_v7, 0.0  ;;  %v437_v15 = vadd.f32 %v436_v11, %v117_v61  ;;  %v438_v17 = vpop.f32.mrb[7].mxu0  ;;  %v531_v27 = vmax.f32 %v476_v18, 0.0  ;;  %v480_v28 = vadd.f32 %v479_v24, %v125_v2  ;;  %v481_v29 = vpop.f32.mrb[7].mxu1  ;;  %v1933_v61 = vld [vmem:[#allocation5 + $0x1a8] sm:$0xff]   ;;  %v1937_v2 = vld [vmem:[#allocation5 + $0x1b0] sm:$0xff]  }
 0x119   :  { %1725 = vmatpush3.bf16.msra.mxu1 %v1915_v3  ;;  %v530_v19 = vmax.f32 %v435_v10, 0.0  ;;  %v439_v22 = vadd.f32 %v438_v17, %v121_v0  ;;  %1747 = vmatpush3.bf16.msra.mxu0 %v1917_v9  ;;  %v532_v32 = vmax.f32 %v478_v23, 0.0  ;;  %v482_v33 = vadd.f32 %v481_v29, %v129_v5  ;;  %v1935_v0 = vld [vmem:[#allocation5 + $0x130] sm:$0xff]   ;;  %v1940_v3 = vld [vmem:[#allocation5 + $0x1f8] sm:$0xff]   ;;  %v1363_v7 = vpop.permute.xlu0 %1362  ;;  %v1373_v9 = vld [vmem:[%s2216_s8] sm:$0xff] }
 0x11a   :  { %1726 = vmatprep.subr.bf16.mxu1 %v1918_v6  ;;  %v538_v26 = vmax.f32 %v437_v15, 0.0  ;;  %1748 = vmatprep.subr.bf16.mxu0 %v1920_v13  ;;  %v540_v36 = vmax.f32 %v480_v28, 0.0  ;;  %v1343_v5 = vand.u32 127, %v98_v16  ;;  %v1941_v6 = vld [vmem:[#allocation5 + $0x1b8] sm:$0xff]   ;;  %v1943_v16 = vld [vmem:[#allocation5 + $0x208] sm:$0xff]   ;;  %v1348_v13 = vpop.permute.xlu1 %1347  ;;  %v1948_v23 = vld [vmem:[#allocation5 + $0x230] sm:$0xff]  }
 0x11b   :  { %v539_v31 = vmax.f32 %v439_v22, 0.0  ;;  %v541_v39 = vmax.f32 %v482_v33, 0.0  ;;  %v1945_v18 = vld [vmem:[#allocation5 + $0x218] sm:$0xff]   ;;  %v1947_v22 = vld [vmem:[#allocation5 + $0x228] sm:$0xff]  }
 0x11c   :  { %v2156_v35 = vpack.c.bf16 %v538_v26, %v529_v14  ;;  %v2158_v41 = vpack.c.bf16 %v540_v36, %v531_v27  ;;  %vm1367_vm4 = vcmp.eq.s32.totalorder %v1363_v7, %v1343_v5  ;;  %v1944_v14 = vld [vmem:[#allocation5 + $0x210] sm:$0xff]   ;;  %vm1352_vm7 = vcmp.eq.s32.totalorder %v1348_v13, %v1343_v5  ;;  %v1949_v24 = vld [vmem:[#allocation5 + $0x238] sm:$0xff]   ;;  %v1593_v26 = vld [vmem:[%s2214_s6] ss:$0 sm:$0xff]  ;;  %s2032_s6 = smov [#allocation7]  }
 0x11d   :  { %1727 = vmatpush3.bf16.msra.mxu1 %v1919_v21  ;;  %v548_v38 = vpack.c.bf16 %v539_v31, %v530_v19  ;;  %1749 = vmatpush3.bf16.msra.mxu0 %v1921_v30  ;;  %v550_v44 = vpack.c.bf16 %v541_v39, %v532_v32  ;;  %v1668_v10 = vsel %vm1367_vm4, 1.0, %v2030_v42  ;;  %v1366_v11 = vpop.permute.xlu0 %1365  ;;  %v1666_v17 = vsel %vm1352_vm7, 1.0, %v2030_v42  ;;  %v1946_v21 = vld [vmem:[#allocation5 + $0x220] sm:$0xff]   ;;  %s1546_s28 = sshll.u32 %s2032_s6, 4  ;;  %s1547_s28 = int_to_ptr.vmem [resolvable:$true] %s1546_s28 }
 0x11e   :  { %1728 = vmatprep.subr.bf16.mxu1 %v1922_v25  ;;  %1750 = vmatprep.subr.bf16.mxu0 %v1924_v34  ;;  %vm1368_vm6 = vcmp.eq.s32.totalorder %v1366_v11, %v1343_v5  ;;  %v1351_v20 = vpop.permute.xlu1 %1350  ;;  %s1994_s29 = scalar_lea.vmem %s1547_s28, 256  ;;  %p1999_p3 = scmp.lt.s32.totalorder %s1547_s28, %s1547_s28 }
 0x11f   :  { %1249 = vmatprep.mubr.bf16.mxu1 %v548_v38  ;;  %1290 = vmatprep.mubr.bf16.mxu0 %v550_v44  ;;  %v1669_v15 = vsel %vm1368_vm6, 1.0, %v2030_v42  ;;  %vm1353_vm8 = vcmp.eq.s32.totalorder %v1351_v20, %v1343_v5  ;;  %p1995_p2 = scmp.ne.s32.totalorder %s1547_s28, %s1994_s29  ;;  %p2000_p4 = scmp.lt.s32.totalorder %s1994_s29, %s1994_s29 }
 0x120   :  { %v1667_v19 = vsel %vm1353_vm8, 1.0, %v2030_v42 }
 0x121   :  { %1729 = vmatpush3.bf16.msra.mxu1 %v1923_v37  ;;  %v518_v48 = vpop.f32.mrb[8].mxu0  ;;  %1751 = vmatpush3.bf16.msra.mxu0 %v1925_v43  ;;  %p2001_p5 = por %p2000_p4, %p1999_p3 }
 0x122   :  { %1730 = vmatprep.subr.bf16.mxu1 %v1926_v40  ;;  %v519_v50 = vadd.f32 %v1559_v45, %v518_v48  ;;  %v1789_v51 = vpop.f32.mrb[9].mxu0  ;;  %1752 = vmatprep.subr.bf16.mxu0 %v1928_v46 }
 0x123   :  { %v521_v53 = vpop.f32.mrb[10].mxu0  ;;  %p2002_p6 = pnand %p2001_p5, %p1995_p2 }
 0x124   :  { %v533_v55 = vmax.f32 %v519_v50, 0.0  ;;  %v522_v56 = vadd.f32 %v1559_v45, %v521_v53  ;;  %v1790_v57 = vpop.f32.mrb[11].mxu0 }
 0x125   :  { %1731 = vmatpush3.bf16.msra.mxu1 %v1927_v47  ;;  %1753 = vmatpush3.bf16.msra.mxu0 %v1929_v52 }
 0x126   :  { %1732 = vmatprep.subr.bf16.mxu1 %v1930_v49  ;;  %v542_v60 = vmax.f32 %v522_v56, 0.0  ;;  %1754 = vmatprep.subr.bf16.mxu0 %v1932_v54 }
 0x128   :  { %v2163_v63 = vpack.c.bf16 %v542_v60, %v533_v55 }
 0x129   :  { %1733 = vmatpush3.bf16.msra.mxu1 %v1931_v58  ;;  %1755 = vmatpush3.bf16.msra.mxu0 %v1933_v61 }
 0x12a   :  { %1734 = vmatprep.subr.bf16.mxu1 %v1934_v59  ;;  %1756 = vmatprep.subr.bf16.mxu0 %v1936_v62 }
 0x12d   :  { %1735 = vmatpush3.bf16.msra.mxu1 %v1935_v0  ;;  %1757 = vmatpush3.bf16.msra.mxu0 %v1937_v2 }
 0x12e   :  { %1736 = vmatprep.subr.bf16.mxu1 %v1938_v1  ;;  %1758 = vmatprep.subr.bf16.mxu0 %v1940_v3 }
 0x131   :  { %1737 = vmatpush3.bf16.msra.mxu1 %v1939_v4  ;;  %1759 = vmatpush3.bf16.msra.mxu0 %v1941_v6 }
 0x132   :  { %1791 = vmatprep.subr.bf16.mxu1 %v2030_v42  ;;  %1811 = vmatprep.subr.mxu0 %v1373_v9 }
 0x134   :  { %1250 = vmatmul.mubr.bf16.vlgmr.msra.gmra.mrb[12].mxu1 %v2156_v35  ;;  %1291 = vmatmul.mubr.bf16.vlgmr.msra.gmra.mrb[16].mxu0 %v2158_v41 }
 0x135   :  { %1792 = vmatpush3.bf16.msra.mxu1 %v1942_v8  ;;  %1807 = vmatprep.mubr.msk.bf16.mxu1 %vm2031_vm3, %v2030_v42 }
 0x136   :  { %1793 = vmatprep.subr.bf16.mxu1 %v2030_v42  ;;  %1812 = vmatpush3.msra.mxu0 %v1373_v9 }
 0x137   :  { %1813 = vmatprep.mubr.msk.f32.mxu0 %vm1374_vm5, %v1668_v10  ;;  %1816 = vmatprep.subr.mxu0 %v1358_v12 }
 0x139   :  { %1794 = vmatpush3.bf16.msra.mxu1 %v1943_v16 }
 0x13a   :  { %1795 = vmatprep.subr.bf16.mxu1 %v2030_v42 }
 0x13c   :  { %1814 = vmatmul.mubr.msk.f32.vlgmr.msra.gmra.mrb[20].mxu0 %vm1374_vm5, %v1669_v15 }
 0x13d   :  { %1796 = vmatpush3.bf16.msra.mxu1 %v1944_v14  ;;  %1817 = vmatpush3.msra.mxu0 %v1358_v12 }
 0x13e   :  { %1797 = vmatprep.subr.bf16.mxu1 %v2030_v42  ;;  %1818 = vmatprep.mubr.msk.f32.mxu0 %vm1374_vm5, %v1666_v17 }
 0x141   :  { %1798 = vmatpush3.bf16.msra.mxu1 %v1945_v18 }
 0x142   :  { %1799 = vmatprep.subr.bf16.mxu1 %v2030_v42 }
 0x144   :  { %1819 = vmatmul.mubr.msk.f32.vlgmr.msra.gmra.mrb[20].mxu0 %vm1374_vm5, %v1667_v19 }
 0x145   :  { %1800 = vmatpush3.bf16.msra.mxu1 %v1946_v21 }
 0x146   :  { %1801 = vmatprep.subr.bf16.mxu1 %v2030_v42 }
 0x149   :  { %1802 = vmatpush3.bf16.msra.mxu1 %v1947_v22 }
 0x14a   :  { %1803 = vmatprep.subr.bf16.mxu1 %v2030_v42 }
 0x14d   :  { %1804 = vmatpush3.bf16.msra.mxu1 %v1948_v23 }
 0x14e   :  { %1805 = vmatprep.subr.bf16.mxu1 %v2030_v42 }
 0x151   :  { %1806 = vmatpush3.bf16.msra.mxu1 %v1949_v24 }
 0x154   :  { %1808 = vmatmul.mubr.bf16.vlgmr.msra.gmra.mrb[16].mxu1 %v2163_v63 }
 0x1e7   :  { %v1694_v25 = vpop.f32.mrb[8].mxu1  ;;  %v1716_v30 = vpop.f32.mrb[12].mxu0 }
 0x1e8   :  { %v1695_v27 = vpop.f32.mrb[9].mxu1  ;;  %v1717_v32 = vpop.f32.mrb[13].mxu0 }
 0x1e9   :  { %v1696_v28 = vadd.f32 %v1695_v27, %v1694_v25  ;;  %v1697_v29 = vpop.f32.mrb[10].mxu1  ;;  %v1718_v35 = vadd.f32 %v1717_v32, %v1716_v30  ;;  %v1719_v36 = vpop.f32.mrb[14].mxu0 }
 0x1ea   :  { %v1698_v31 = vpop.f32.mrb[11].mxu1  ;;  %v1720_v37 = vpop.f32.mrb[15].mxu0 }
 0x1eb   :  { %v1170_v33 = vadd.f32 %v1696_v28, %v1593_v26  ;;  %v1699_v34 = vadd.f32 %v1698_v31, %v1697_v29  ;;  %v1721_v39 = vadd.f32 %v1720_v37, %v1719_v36 }
 0x1ed   :  { %v1173_v42 = vadd.f32 %v1699_v34, %v1593_v26  ;;  %v1211_v38 = vadd.f32 %v1718_v35, %v1170_v33 }
 0x1ef   :  { %v1214_v40 = vadd.f32 %v1721_v39, %v1173_v42 }
 0x207   :  { %v1738_v41 = vpop.f32.mrb[12].mxu1  ;;  %v1760_v46 = vpop.f32.mrb[16].mxu0 }
 0x208   :  { %v1739_v43 = vpop.f32.mrb[13].mxu1  ;;  %v1761_v48 = vpop.f32.mrb[17].mxu0 }
 0x209   :  { %v1740_v44 = vadd.f32 %v1739_v43, %v1738_v41  ;;  %v1741_v45 = vpop.f32.mrb[14].mxu1  ;;  %v1762_v51 = vadd.f32 %v1761_v48, %v1760_v46  ;;  %v1763_v52 = vpop.f32.mrb[18].mxu0 }
 0x20a   :  { %v1742_v47 = vpop.f32.mrb[15].mxu1  ;;  %v1764_v53 = vpop.f32.mrb[19].mxu0 }
 0x20b   :  { %v1252_v49 = vadd.f32 %v1740_v44, %v1211_v38  ;;  %v1743_v50 = vadd.f32 %v1742_v47, %v1741_v45  ;;  %v1765_v55 = vadd.f32 %v1764_v53, %v1763_v52 }
 0x20d   :  { %v1255_v54 = vadd.f32 %v1743_v50, %v1214_v40  ;;  %v1293_v56 = vadd.f32 %v1762_v51, %v1252_v49 }
 0x20f   :  { %v1296_v57 = vadd.f32 %v1765_v55, %v1255_v54 }
 0x217   :  { %v1820_v58 = vpop.f32.mrb[20].mxu0 }
 0x218   :  { %v1528_v59 = vpop.f32.mrb[21].mxu0 }
 0x227   :  { %v1333_v60 = vpop.f32.mrb[16].mxu1 }
 0x228   :  { %v1334_v61 = vadd.f32 %v1333_v60, %v1293_v56  ;;  %v1809_v62 = vpop.f32.mrb[17].mxu1 }
 0x229   :  { %v1336_v63 = vpop.f32.mrb[18].mxu1 }
 0x22a   :  { %v1340_v0 = vmax.f32 %v1334_v61, 0.0  ;;  %v1337_v1 = vadd.f32 %v1336_v63, %v1296_v57  ;;  %v1810_v2 = vpop.f32.mrb[19].mxu1 }
 0x22c   :  { %v1537_v3 = vadd.f32 %v1528_v59, %v1340_v0  ;;  %v1341_v4 = vmax.f32 %v1337_v1, 0.0 }
 0x22e   :  { %1539 = vst [vmem:[#allocation7] sm:$0xff] %v1537_v3  ;;  %v1538_v5 = vadd.f32 %v1820_v58, %v1341_v4 }
 0x230   :  { %1540 = vst [vmem:[#allocation7 + $0x8] sm:$0xff] %v1538_v5 }
 0x231   :  { %2005 = shalt.err (!%p2002_p6)
}
 0x232   :  { %s2006_s12 = scalar_lea.hbm %s2217_s9, 256 }
 0x233   :  { %p2007_p7 = scmp.ne.s32.totalorder %s2217_s9, %s2006_s12  ;;  %p2010_p8 = scmp.lt.u32.totalorder %s2006_s12, %s2217_s9 }
 0x235   :  { %p2012_p9 = pnand %p2010_p8, %p2007_p7 }
 0x237   :  { %2015 = shalt.err (!%p2012_p9)
}
 0x238   :  { %s2033_s5 = smov 128   ;;  %s2034_s15 = smov 8  }
 0x239   :  { %1552 = dma.vmem_to_hbm [thread:$0]  %s1547_s28, 256, %s2217_s9, [#allocation4], %s2033_s5, %s2033_s5, %s2034_s15  }
 0x23a   :  { %2020 = dma.done.wait [#allocation4], 256  }
 0x23b   :  { %2021 = vsyncadd [#allocation4], 4294967040 }
 0x23c   :  { %1556 = vsyncpa [#allocation3], 1 }
 0x23d   :  { %1557 = vsyncpa [#allocation6], 1 }
 0x23e   :  { %1558 = vsyncpa [#allocation4], 1 }

</bundles_post_ra>
